<compile_context>
chip_gen: v5e
topology: v5e:2x2
jax: 0.10.0
libtpu: 0.0.40
codegen_flags: <defaults>
</compile_context>

<pallas_src>
import numpy as np
import jax
import jax.numpy as jnp
from jax import lax
from jax.experimental import pallas as pl
from jax.experimental.pallas import tpu as pltpu


H, W = 8, 8
C1, C2 = 16, 32          # conv channel widths from the PyTorch module


# --------------------------------- kernel ------------------------------------

def _stacked_conv_kernel(x_ref, m1_ref, b1_ref, m2_ref, b2_ref, wf_ref, bf_ref, o_ref):
    # x_ref: (bt, H*W*in_dim) lane-dense flattened NHWC input tile (native dtype).
    x = x_ref[...].astype(jnp.bfloat16)
    # [Linear(in_dim,16) folded into Conv2d(16,16,3,2,1)] : 8x8 -> 4x4, then ReLU
    h = jnp.dot(x, m1_ref[...], preferred_element_type=jnp.float32) + b1_ref[...]
    h = jnp.maximum(h, 0.0).astype(jnp.bfloat16)
    # Conv2d(16,32,3,2,1) : 4x4 -> 2x2, then ReLU
    h = jnp.dot(h, m2_ref[...], preferred_element_type=jnp.float32) + b2_ref[...]
    h = jnp.maximum(h, 0.0).astype(jnp.bfloat16)
    # Flatten + Linear(128, out_dim)  (rows pre-permuted to NHWC, cols lane-padded)
    out = jnp.dot(h, wf_ref[...], preferred_element_type=jnp.float32) + bf_ref[...]
    o_ref[...] = out.astype(o_ref.dtype)


# ----------------------- host-side parameter folding -------------------------

def _fold_params(params, in_dim, out_dim):
    """One-time glue: fold Linear+conv1, conv2 and the final Linear into three dense,
    lane-friendly matrices (requires concrete params).  Weight matrices are returned
    in bf16 (MXU-native); biases stay f32 (added to the f32 accumulator)."""
    wl, bl, w1, b1, w2, b2, wf, bf = [np.asarray(p, np.float32) for p in params]

    # ---- layer 1: Linear(in_dim,16) folded into conv1 as one dense matrix ----
    w1f = np.einsum('ic,hwco->hwio', wl, w1)           # (3,3,in_dim,16)
    blf = np.einsum('c,hwco->hwo', bl, w1)             # (3,3,16): bl through each tap
    m1 = np.zeros((H * W * in_dim, 4 * 4 * C1), np.float32)
    b1map = np.tile(b1, (4, 4, 1)).astype(np.float32)  # (4,4,16) per-position bias
    for oh in range(4):
        for ow in range(4):
            col = (oh * 4 + ow) * C1
            for kh in range(3):
                for kw in range(3):
                    ih, iw = 2 * oh - 1 + kh, 2 * ow - 1 + kw
                    if 0 <= ih < H and 0 <= iw < W:          # zero padding: no entry
                        row = (ih * W + iw) * in_dim
                        m1[row:row + in_dim, col:col + C1] = w1f[kh, kw]
                        b1map[oh, ow] += blf[kh, kw]          # bl only via valid taps
    b1f = b1map.reshape(1, 4 * 4 * C1)

    # ---- layer 2: Conv2d(16,32,3,2,1) as one dense matrix, 4x4 -> 2x2 ----
    m2 = np.zeros((4 * 4 * C1, 2 * 2 * C2), np.float32)
    for oh in range(2):
        for ow in range(2):
            col = (oh * 2 + ow) * C2
            for kh in range(3):
                for kw in range(3):
                    ih, iw = 2 * oh - 1 + kh, 2 * ow - 1 + kw
                    if 0 <= ih < 4 and 0 <= iw < 4:
                        row = (ih * 4 + iw) * C1
                        m2[row:row + C1, col:col + C2] = w2[kh, kw]
    b2f = np.tile(b2, 4).reshape(1, 2 * 2 * C2)

    # ---- final Linear: permute rows NCHW-flatten -> NHWC-flatten, pad lanes ----
    ii = np.arange(2)[:, None, None]
    jj = np.arange(2)[None, :, None]
    cc = np.arange(C2)[None, None, :]
    perm = (cc * 4 + ii * 2 + jj).reshape(-1)          # nhwc position -> nchw row
    wf_nhwc = wf[perm]                                 # (128, out_dim)
    out_dim_p = max(128, ((out_dim + 127) // 128) * 128)
    wf_p = np.zeros((2 * 2 * C2, out_dim_p), np.float32)
    wf_p[:, :out_dim] = wf_nhwc
    bf_p = np.zeros((1, out_dim_p), np.float32)
    bf_p[0, :out_dim] = bf

    return (jnp.asarray(m1, jnp.bfloat16), jnp.asarray(b1f, jnp.float32),
            jnp.asarray(m2, jnp.bfloat16), jnp.asarray(b2f, jnp.float32),
            jnp.asarray(wf_p, jnp.bfloat16), jnp.asarray(bf_p, jnp.float32),
            out_dim_p)


# --------------------------------- wrapper -----------------------------------

def _choose_bt(B, kin, out_dim_p, bt_max):
    """Batch-tile size: multiple of 8, targets >=4 grid steps (>=2 per v7x TC) while
    allowing large tiles on single-TC chips; guarded against a v7x VMEM blowup."""
    if B <= 8:
        return B                                # full-array block, single grid step
    quarter = -(-B // 4)                        # aim for ~4 grid steps
    bt = max(8, min(bt_max, ((quarter + 7) // 8) * 8))
    # Conservative VMEM budget: 2x double-buffered (input f32 + output f32) tiles.
    budget = 24 * 1024 * 1024
    per_row = 2 * 4 * (kin + out_dim_p)
    bt_fit = max(8, (budget // per_row) // 8 * 8)
    return min(bt, bt_fit)


def _forward(x, weights, out_dim, out_dim_p, bt_max):
    m1, b1f, m2, b2f, wf_p, bf_p = weights
    *dims, h, w, c = x.shape
    assert h == H and w == W, "StackedConv_8x8 expects 8x8 spatial input"
    B = int(np.prod(dims)) if dims else 1
    kin = H * W * c
    xf = x.reshape(B, kin)                      # lane-dense flatten, native dtype

    bt = _choose_bt(B, kin, out_dim_p, bt_max)
    grid = pl.cdiv(B, bt)                       # partial last block: OOB rows dropped

    out = pl.pallas_call(
        _stacked_conv_kernel,
        out_shape=jax.ShapeDtypeStruct((B, out_dim_p), jnp.float32),
        grid_spec=pltpu.PrefetchScalarGridSpec(
            num_scalar_prefetch=0,
            grid=(grid,),
            in_specs=[
                pl.BlockSpec((bt, kin), lambda ib: (ib, 0)),
                pl.BlockSpec(m1.shape, lambda ib: (0, 0)),
                pl.BlockSpec(b1f.shape, lambda ib: (0, 0)),
                pl.BlockSpec(m2.shape, lambda ib: (0, 0)),
                pl.BlockSpec(b2f.shape, lambda ib: (0, 0)),
                pl.BlockSpec(wf_p.shape, lambda ib: (0, 0)),
                pl.BlockSpec(bf_p.shape, lambda ib: (0, 0)),
            ],
            out_specs=pl.BlockSpec((bt, out_dim_p), lambda ib: (ib, 0)),
        ),
        compiler_params=pltpu.CompilerParams(
            dimension_semantics=("parallel",),
            vmem_limit_bytes=32 * 1024 * 1024,
        ),
    )(xf, m1, b1f, m2, b2f, wf_p, bf_p)

    # Lane-only slice (batch is unpadded).  If the downstream MLP can consume the
    # lane-padded slab directly, skip this to save one output-sized HBM round trip.
    out = out[:, :out_dim]
    return out.reshape(*dims, 1, out_dim)


def make_stacked_conv_8x8(params, *, bt_max=1024):
    """Fold params once (host-side numpy + single upload) and return a jitted
    callable: x (*dims, 8, 8, in_dim) -> (*dims, 1, out_dim)."""
    in_dim = int(np.asarray(params[0]).shape[0])
    out_dim = int(np.asarray(params[6]).shape[1])
    *weights, out_dim_p = _fold_params(params, in_dim, out_dim)

    @jax.jit
    def fwd(x, *w):
        return _forward(x, w, out_dim, out_dim_p, bt_max)

    return lambda x: fwd(x, *weights)


def stacked_conv_8x8(x, params, *, bt_max=1024):
    """Convenience one-shot wrapper (folds params on every call; prefer
    make_stacked_conv_8x8 for repeated use)."""
    return make_stacked_conv_8x8(params, bt_max=bt_max)(x)


# ------------------------------ pure-JAX reference ----------------------------

def reference(x, params):
    wl, bl, w1_hwio, b1, w2_hwio, b2, wf, bf = params
    *dims, h, w, c = x.shape
    B = int(np.prod(dims)) if dims else 1
    dn = ('NHWC', 'HWIO', 'NHWC')
    y = x.reshape(B, h, w, c) @ wl + bl
    y = lax.conv_general_dilated(y, w1_hwio, (2, 2), ((1, 1), (1, 1)),
                                 dimension_numbers=dn) + b1
    y = jnp.maximum(y, 0.0)
    y = lax.conv_general_dilated(y, w2_hwio, (2, 2), ((1, 1), (1, 1)),
                                 dimension_numbers=dn) + b2
    y = jnp.maximum(y, 0.0)
    y = jnp.transpose(y, (0, 3, 1, 2)).reshape(B, 2 * 2 * 32)   # nn.Flatten on NCHW
    y = y @ wf + bf
    return y.reshape(*dims, 1, wf.shape[1])


# ------------------------------ deterministic init ----------------------------

def init_params(key, in_dim, out_dim):
    ks = jax.random.split(key, 8)
    s = 0.1
    wl = jax.random.normal(ks[0], (in_dim, 16), jnp.float32) * s      # Linear(in_dim,16)
    bl = jax.random.normal(ks[1], (16,), jnp.float32) * s
    w1 = jax.random.normal(ks[2], (3, 3, 16, 16), jnp.float32) * s    # Conv2d(16,16,3,2,1) HWIO
    b1 = jax.random.normal(ks[3], (16,), jnp.float32) * s
    w2 = jax.random.normal(ks[4], (3, 3, 16, 32), jnp.float32) * s    # Conv2d(16,32,3,2,1) HWIO
    b2 = jax.random.normal(ks[5], (32,), jnp.float32) * s
    wf = jax.random.normal(ks[6], (2 * 2 * 32, out_dim), jnp.float32) * s  # Linear(128,out_dim)
    bf = jax.random.normal(ks[7], (out_dim,), jnp.float32) * s
    return (wl, bl, w1, b1, w2, b2, wf, bf)


if __name__ == "__main__":
    key = jax.random.PRNGKey(0)
    kp, kx1, kx2 = jax.random.split(key, 3)

    in_dim, out_dim = 4, 32
    params = init_params(kp, in_dim, out_dim)
    view_enc = make_stacked_conv_8x8(params)          # fold + upload once

    # bf16 matmul operands (f32 accumulation) -> compare to the f32 reference with
    # loosened tolerance.
    rtol, atol = 2e-2, 2e-2

    # small shape consistent with the module: (*dims, 8, 8, in_dim)
    dims = (2, 8)
    x = jax.random.normal(kx1, (*dims, 8, 8, in_dim), jnp.float32)
    out = jax.block_until_ready(view_enc(x))
    assert out.shape == (*dims, 1, out_dim)
    np.testing.assert_allclose(np.asarray(out), np.asarray(reference(x, params)),
                               rtol=rtol, atol=atol)

    # larger, non-divisible batch exercises the partial-last-block path (no jnp.pad)
    x2 = jax.random.normal(kx2, (600, 8, 8, in_dim), jnp.float32)
    out2 = jax.block_until_ready(view_enc(x2))
    assert out2.shape == (600, 1, out_dim)
    np.testing.assert_allclose(np.asarray(out2), np.asarray(reference(x2, params)),
                               rtol=rtol, atol=atol)

    print("KERNEL_OK")
</pallas_src>

<mosaic_0001>
module attributes {stable_mosaic.version = 11 : i64} {
  func.func @_stacked_conv_kernel(%arg0: i32, %arg1: memref<8x256xf32, #tpu.memory_space<vmem>>, %arg2: memref<256x256xbf16, #tpu.memory_space<vmem>>, %arg3: memref<1x256xf32, #tpu.memory_space<vmem>>, %arg4: memref<256x128xbf16, #tpu.memory_space<vmem>>, %arg5: memref<1x128xf32, #tpu.memory_space<vmem>>, %arg6: memref<128x128xbf16, #tpu.memory_space<vmem>>, %arg7: memref<1x128xf32, #tpu.memory_space<vmem>>, %arg8: memref<8x128xf32, #tpu.memory_space<vmem>>) attributes {dimension_semantics = [#tpu.dimension_semantics<parallel>], iteration_bounds = array<i64: 2>, scalar_prefetch = 0 : i64, scratch_operands = 0 : i64, tpu.core_type = #tpu.core_type<tc>, window_params = [{transform_indices = @transform_0, window_bounds = array<i64: 8, 256>}, {pipeline_mode = #tpu.pipeline_mode<synchronous>, transform_indices = @transform_1, window_bounds = array<i64: 256, 256>}, {pipeline_mode = #tpu.pipeline_mode<synchronous>, transform_indices = @transform_2, window_bounds = array<i64: 1, 256>}, {pipeline_mode = #tpu.pipeline_mode<synchronous>, transform_indices = @transform_3, window_bounds = array<i64: 256, 128>}, {pipeline_mode = #tpu.pipeline_mode<synchronous>, transform_indices = @transform_4, window_bounds = array<i64: 1, 128>}, {pipeline_mode = #tpu.pipeline_mode<synchronous>, transform_indices = @transform_5, window_bounds = array<i64: 128, 128>}, {pipeline_mode = #tpu.pipeline_mode<synchronous>, transform_indices = @transform_6, window_bounds = array<i64: 1, 128>}, {transform_indices = @transform_7, window_bounds = array<i64: 8, 128>}]} {
    %c0 = arith.constant 0 : index
    %c0_0 = arith.constant 0 : index
    %0 = vector.load %arg1[%c0, %c0_0] : memref<8x256xf32, #tpu.memory_space<vmem>>, vector<8x256xf32>
    %1 = arith.truncf %0 : vector<8x256xf32> to vector<8x256xbf16>
    %c0_1 = arith.constant 0 : index
    %c0_2 = arith.constant 0 : index
    %2 = vector.load %arg2[%c0_1, %c0_2] : memref<256x256xbf16, #tpu.memory_space<vmem>>, vector<256x256xbf16>
    %cst = arith.constant dense<0.000000e+00> : vector<8x256xf32>
    %3 = tpu.matmul %1, %2, %cst {dimension_numbers = #tpu.dot_dimension_numbers<[1], [0], [0], [1], [0, 0, 1, 1], [], []>} : vector<8x256xbf16>, vector<256x256xbf16>, vector<8x256xf32> -> vector<8x256xf32>
    %c0_3 = arith.constant 0 : index
    %c0_4 = arith.constant 0 : index
    %4 = vector.load %arg3[%c0_3, %c0_4] : memref<1x256xf32, #tpu.memory_space<vmem>>, vector<1x256xf32>
    %5 = vector.broadcast %4 : vector<1x256xf32> to vector<8x256xf32>
    %6 = arith.addf %3, %5 : vector<8x256xf32>
    %cst_5 = arith.constant 0.000000e+00 : f32
    %7 = vector.broadcast %cst_5 : f32 to vector<8x256xf32>
    %8 = arith.maximumf %6, %7 : vector<8x256xf32>
    %9 = arith.truncf %8 : vector<8x256xf32> to vector<8x256xbf16>
    %c0_6 = arith.constant 0 : index
    %c0_7 = arith.constant 0 : index
    %10 = vector.load %arg4[%c0_6, %c0_7] : memref<256x128xbf16, #tpu.memory_space<vmem>>, vector<256x128xbf16>
    %cst_8 = arith.constant dense<0.000000e+00> : vector<8x128xf32>
    %11 = tpu.matmul %9, %10, %cst_8 {dimension_numbers = #tpu.dot_dimension_numbers<[1], [0], [0], [1], [0, 0, 1, 1], [], []>} : vector<8x256xbf16>, vector<256x128xbf16>, vector<8x128xf32> -> vector<8x128xf32>
    %c0_9 = arith.constant 0 : index
    %c0_10 = arith.constant 0 : index
    %12 = vector.load %arg5[%c0_9, %c0_10] : memref<1x128xf32, #tpu.memory_space<vmem>>, vector<1x128xf32>
    %13 = vector.broadcast %12 : vector<1x128xf32> to vector<8x128xf32>
    %14 = arith.addf %11, %13 : vector<8x128xf32>
    %cst_11 = arith.constant 0.000000e+00 : f32
    %15 = vector.broadcast %cst_11 : f32 to vector<8x128xf32>
    %16 = arith.maximumf %14, %15 : vector<8x128xf32>
    %17 = arith.truncf %16 : vector<8x128xf32> to vector<8x128xbf16>
    %c0_12 = arith.constant 0 : index
    %c0_13 = arith.constant 0 : index
    %18 = vector.load %arg6[%c0_12, %c0_13] : memref<128x128xbf16, #tpu.memory_space<vmem>>, vector<128x128xbf16>
    %cst_14 = arith.constant dense<0.000000e+00> : vector<8x128xf32>
    %19 = tpu.matmul %17, %18, %cst_14 {dimension_numbers = #tpu.dot_dimension_numbers<[1], [0], [0], [1], [0, 0, 1, 1], [], []>} : vector<8x128xbf16>, vector<128x128xbf16>, vector<8x128xf32> -> vector<8x128xf32>
    %c0_15 = arith.constant 0 : index
    %c0_16 = arith.constant 0 : index
    %20 = vector.load %arg7[%c0_15, %c0_16] : memref<1x128xf32, #tpu.memory_space<vmem>>, vector<1x128xf32>
    %21 = vector.broadcast %20 : vector<1x128xf32> to vector<8x128xf32>
    %22 = arith.addf %19, %21 : vector<8x128xf32>
    %c0_17 = arith.constant 0 : index
    %c0_18 = arith.constant 0 : index
    %23 = vector.load %arg8[%c0_17, %c0_18] : memref<8x128xf32, #tpu.memory_space<vmem>>, vector<8x128xf32>
    tpu.vector_store %arg8[%c0_17, %c0_18], %22 {strides = array<i32>} : memref<8x128xf32, #tpu.memory_space<vmem>>, vector<8x128xf32>,
    return
  }
  func.func @transform_0(%arg0: i32) -> (i32, i32) {
    %c0_i32 = arith.constant 0 : i32
    %c0_i32_0 = arith.constant 0 : i32
    return %arg0, %c0_i32 : i32, i32
  }
  func.func @transform_1(%arg0: i32) -> (i32, i32) {
    %c0_i32 = arith.constant 0 : i32
    %c0_i32_0 = arith.constant 0 : i32
    %c0_i32_1 = arith.constant 0 : i32
    return %c0_i32, %c0_i32_0 : i32, i32
  }
  func.func @transform_2(%arg0: i32) -> (i32, i32) {
    %c0_i32 = arith.constant 0 : i32
    %c0_i32_0 = arith.constant 0 : i32
    %c0_i32_1 = arith.constant 0 : i32
    return %c0_i32, %c0_i32_0 : i32, i32
  }
  func.func @transform_3(%arg0: i32) -> (i32, i32) {
    %c0_i32 = arith.constant 0 : i32
    %c0_i32_0 = arith.constant 0 : i32
    %c0_i32_1 = arith.constant 0 : i32
    return %c0_i32, %c0_i32_0 : i32, i32
  }
  func.func @transform_4(%arg0: i32) -> (i32, i32) {
    %c0_i32 = arith.constant 0 : i32
    %c0_i32_0 = arith.constant 0 : i32
    %c0_i32_1 = arith.constant 0 : i32
    return %c0_i32, %c0_i32_0 : i32, i32
  }
  func.func @transform_5(%arg0: i32) -> (i32, i32) {
    %c0_i32 = arith.constant 0 : i32
    %c0_i32_0 = arith.constant 0 : i32
    %c0_i32_1 = arith.constant 0 : i32
    return %c0_i32, %c0_i32_0 : i32, i32
  }
  func.func @transform_6(%arg0: i32) -> (i32, i32) {
    %c0_i32 = arith.constant 0 : i32
    %c0_i32_0 = arith.constant 0 : i32
    %c0_i32_1 = arith.constant 0 : i32
    return %c0_i32, %c0_i32_0 : i32, i32
  }
  func.func @transform_7(%arg0: i32) -> (i32, i32) {
    %c0_i32 = arith.constant 0 : i32
    %c0_i32_0 = arith.constant 0 : i32
    return %arg0, %c0_i32 : i32, i32
  }
}

</mosaic_0001>

<bundles_post_ra>
// kernel: fwd.1
= control target key start
LH: loop header
LB: loop body
LE: loop exit
PB: predicated region body
PF: predicated region fallthrough
CT: control target
= control target key end

     0   :  { %12 = vsyncpa [#allocation3], 0  ;;  %s1647_s0 = inlined_call_operand.vmem [shape: f32[16,256], index: 0, kind: input, shape index: {}]   ;;  %s1648_s1 = inlined_call_operand.vmem [shape: bf16[256,256], index: 1, kind: input, shape index: {}]   ;;  %s1649_s2 = inlined_call_operand.vmem [shape: f32[1,256], index: 2, kind: input, shape index: {}]   ;;  %s1650_s3 = inlined_call_operand.vmem [shape: bf16[256,128], index: 3, kind: input, shape index: {}]   ;;  %s1651_s4 = inlined_call_operand.vmem [shape: f32[1,128], index: 4, kind: input, shape index: {}]   ;;  %s1652_s5 = inlined_call_operand.vmem [shape: bf16[128,128], index: 5, kind: input, shape index: {}]   ;;  %s1653_s6 = inlined_call_operand.vmem [shape: f32[1,128], index: 6, kind: input, shape index: {}]   ;;  %s1654_s7 = inlined_call_operand.hbm [shape: f32[16,128], index: 7, kind: output, shape index: {}]  }
   0x1   :  { %14 = vsyncpa [#allocation3 + $0x1], 0  ;;  %s1289_s24 = smov 0   ;;  %s1291_s25 = smov 0  }
   0x2   :  { %s1293_s26 = smov 0   ;;  %s1295_s27 = smov 0  }
   0x3 LB: > { %s1310_s28 = sadd.s32 4294967295, %s1247_s27   ;;  %s852_s29 = sadd.s32 4294967294, %s1247_s27   ;;  %s1247_s27 = sphi %s1295_s27, %s1660_s27   ;;  %s1243_s26 = sphi %s1293_s26, %s1659_s26   ;;  %s1239_s25 = sphi %s1291_s25, %s1658_s25   ;;  %s1235_s24 = sphi %s1289_s24, %s1657_s24  }
   0x4   : > { %s1314_s30 = sadd.s32 1, %s1247_s27   ;;  %s179_s8 = sadd.s32 1, %s1243_s26 }
   0x5   : > { %s176_s9 = ssub.s32 %s1247_s27, %s1314_s30  ;;  %p189_p0 = scmp.ne.s32.totalorder %s1243_s26, %s1239_s25 }
   0x6   : > { %p177_p1 = scmp.eq.s32.totalorder %s176_s9, 0  ;;  %p190_p2 = scmp.eq.s32.totalorder %s1310_s28, 1 }
   0x7   : > { %p195_p3 = scmp.ne.s32.totalorder %s1239_s25, %s1235_s24  ;;  %p196_p4 = scmp.eq.s32.totalorder %s852_s29, 1 }
   0x8   : > { %s1325_s10 = scalar_select %p177_p1, %s1243_s26, %s179_s8  }
   0x9   : > { %p1327_p5 = por %p190_p2, %p189_p0  ;;  %p1331_p6 = por %p196_p4, %p195_p3 }
   0xa   : > { %p855_p7 = scmp.ge.s32.totalorder %s1247_s27, 1  ;;  %p240_p8 = scmp.lt.s32.totalorder %s1247_s27, 3 }
   0xc   : > { %p241_p9 = pnand %p855_p7, %p240_p8 }
   0xd   : > { %p272_p10 = scmp.lt.s32.totalorder (!%p241_p9), %s1310_s28, 1  ;;  %s269_s16 = sand.u32 (!%p241_p9), 1, %s1239_s25  }
   0xe   : > { %244 = sbr.rel (%p241_p9) target bundleno = 467 (0x1d3), region = 48  ;;  %s1084_s17 = sshll.u32 (!%p241_p9), %s1310_s28, 3 }
   0xf   : > { %s856_s18 = sshll.u32 (!%p241_p9), %s269_s16, 3  ;;  %s788_s21 = scalar_lea.hbm (!%p241_p9), %s1654_s7, %s1084_s17 }
  0x10   : > { %s271_s29 = scalar_lea.vmem (!%p241_p9), [#allocation2], %s856_s18  ;;  %s778_s13 = scalar_lea.sflag (!%p241_p9), [#allocation3], %s269_s16 }
  0x11   : > { %s790_s8 = sshll.u32 (!%p241_p9), %s271_s29, 4  ;;  %s791_s8 = int_to_ptr.vmem [resolvable:$true] %s790_s8 }
  0x13   : > { %v917_v0 = vld [vmem:[%s1648_s1 + $0x70] sm:$0xf]  ;;  %v1103_v1 = vld [vmem:[%s1648_s1 + $0x74] sm:$0xf0]  ;;  %v1102_v5 = vld [vmem:[%s1648_s1 + $0x74] sm:$0xf] }
  0x14   : > { %v981_v2 = vld [vmem:[%s1648_s1 + $0xf0] sm:$0xf]  ;;  %v918_v3 = vor.u32 %v1103_v1, %v917_v0  ;;  %v1119_v4 = vld [vmem:[%s1648_s1 + $0xf4] sm:$0xf0]  ;;  %v919_v6 = vld [vmem:[%s1648_s1 + $0x78] sm:$0xf0] }
  0x15   : > { %v982_v7 = vor.u32 %v1119_v4, %v981_v2  ;;  %v922_v8 = vor.u32 %v1102_v5, %v919_v6  ;;  %v1118_v9 = vld [vmem:[%s1648_s1 + $0xf4] sm:$0xf]  ;;  %v983_v10 = vld [vmem:[%s1648_s1 + $0xf8] sm:$0xf0]  ;;  %v909_v11 = vld [vmem:[%s1648_s1 + $0x60] sm:$0xf] }
  0x16   : > { %479 = vmatpush.bf16.msra.mxu0 %v918_v3  ;;  %v986_v12 = vor.u32 %v1118_v9, %v983_v10  ;;  %v1101_v13 = vld [vmem:[%s1648_s1 + $0x64] sm:$0xf0]  ;;  %v973_v14 = vld [vmem:[%s1648_s1 + $0xe0] sm:$0xf]  ;;  %v1100_v18 = vld [vmem:[%s1648_s1 + $0x64] sm:$0xf] }
  0x17   : > { %v1117_v15 = vld [vmem:[%s1648_s1 + $0xe4] sm:$0xf0]  ;;  %492 = vmatpush.bf16.msra.mxu1 %v982_v7  ;;  %505 = vmatpush.bf16.msra.mxu2 %v922_v8  ;;  %v910_v16 = vor.u32 %v1101_v13, %v909_v11  ;;  %v911_v19 = vld [vmem:[%s1648_s1 + $0x68] sm:$0xf0]  ;;  %v1116_v20 = vld [vmem:[%s1648_s1 + $0xe4] sm:$0xf] }
  0x18   : > { %v974_v17 = vor.u32 %v1117_v15, %v973_v14  ;;  %518 = vmatpush.bf16.msra.mxu3 %v986_v12  ;;  %v914_v21 = vor.u32 %v1100_v18, %v911_v19  ;;  %v975_v22 = vld [vmem:[%s1648_s1 + $0xe8] sm:$0xf0]  ;;  %v901_v23 = vld [vmem:[%s1648_s1 + $0x50] sm:$0xf]  ;;  %v1099_v24 = vld [vmem:[%s1648_s1 + $0x54] sm:$0xf0] }
  0x19   : > { %v978_v25 = vor.u32 %v1116_v20, %v975_v22  ;;  %v965_v26 = vld [vmem:[%s1648_s1 + $0xd0] sm:$0xf]  ;;  %v1115_v27 = vld [vmem:[%s1648_s1 + $0xd4] sm:$0xf0]  ;;  %v1098_v28 = vld [vmem:[%s1648_s1 + $0x54] sm:$0xf]  ;;  %v902_v29 = vor.u32 %v1099_v24, %v901_v23 }
  0x1a   : > { %480 = vmatpush.bf16.msra.mxu0 %v910_v16  ;;  %v903_v30 = vld [vmem:[%s1648_s1 + $0x58] sm:$0xf0]  ;;  %v1114_v31 = vld [vmem:[%s1648_s1 + $0xd4] sm:$0xf]  ;;  %v966_v33 = vor.u32 %v1115_v27, %v965_v26  ;;  %v893_v35 = vld [vmem:[%s1648_s1 + $0x40] sm:$0xf] }
  0x1b   : > { %v967_v32 = vld [vmem:[%s1648_s1 + $0xd8] sm:$0xf0]  ;;  %493 = vmatpush.bf16.msra.mxu1 %v974_v17  ;;  %506 = vmatpush.bf16.msra.mxu2 %v914_v21  ;;  %v906_v34 = vor.u32 %v1098_v28, %v903_v30  ;;  %v1097_v36 = vld [vmem:[%s1648_s1 + $0x44] sm:$0xf0]  ;;  %v957_v37 = vld [vmem:[%s1648_s1 + $0xc0] sm:$0xf] }
  0x1c   : > { %519 = vmatpush.bf16.msra.mxu3 %v978_v25  ;;  %v970_v38 = vor.u32 %v1114_v31, %v967_v32  ;;  %v1113_v39 = vld [vmem:[%s1648_s1 + $0xc4] sm:$0xf0]  ;;  %v1096_v40 = vld [vmem:[%s1648_s1 + $0x44] sm:$0xf]  ;;  %v895_v41 = vld [vmem:[%s1648_s1 + $0x48] sm:$0xf0]  ;;  %v894_v44 = vor.u32 %v1097_v36, %v893_v35 }
  0x1d   : > { %v1112_v42 = vld [vmem:[%s1648_s1 + $0xc4] sm:$0xf]  ;;  %v959_v43 = vld [vmem:[%s1648_s1 + $0xc8] sm:$0xf0]  ;;  %v958_v45 = vor.u32 %v1113_v39, %v957_v37  ;;  %v898_v46 = vor.u32 %v1096_v40, %v895_v41  ;;  %v885_v47 = vld [vmem:[%s1648_s1 + $0x30] sm:$0xf] }
  0x1e   : > { %481 = vmatpush.bf16.msra.mxu0 %v902_v29  ;;  %v1095_v48 = vld [vmem:[%s1648_s1 + $0x34] sm:$0xf0]  ;;  %v949_v49 = vld [vmem:[%s1648_s1 + $0xb0] sm:$0xf]  ;;  %v962_v50 = vor.u32 %v1112_v42, %v959_v43  ;;  %v1094_v52 = vld [vmem:[%s1648_s1 + $0x34] sm:$0xf] }
  0x1f   : > { %494 = vmatpush.bf16.msra.mxu1 %v966_v33  ;;  %507 = vmatpush.bf16.msra.mxu2 %v906_v34  ;;  %v1111_v51 = vld [vmem:[%s1648_s1 + $0xb4] sm:$0xf0]  ;;  %v887_v53 = vld [vmem:[%s1648_s1 + $0x38] sm:$0xf0]  ;;  %v1110_v54 = vld [vmem:[%s1648_s1 + $0xb4] sm:$0xf]  ;;  %v886_v56 = vor.u32 %v1095_v48, %v885_v47 }
  0x20   : > { %520 = vmatpush.bf16.msra.mxu3 %v970_v38  ;;  %v951_v55 = vld [vmem:[%s1648_s1 + $0xb8] sm:$0xf0]  ;;  %v950_v57 = vor.u32 %v1111_v51, %v949_v49  ;;  %v890_v58 = vor.u32 %v1094_v52, %v887_v53  ;;  %v877_v59 = vld [vmem:[%s1648_s1 + $0x20] sm:$0xf]  ;;  %v1093_v60 = vld [vmem:[%s1648_s1 + $0x24] sm:$0xf0] }
  0x21   : > { %v941_v61 = vld [vmem:[%s1648_s1 + $0xa0] sm:$0xf]  ;;  %v954_v62 = vor.u32 %v1110_v54, %v951_v55  ;;  %v1109_v63 = vld [vmem:[%s1648_s1 + $0xa4] sm:$0xf0]  ;;  %v1092_v0 = vld [vmem:[%s1648_s1 + $0x24] sm:$0xf]  ;;  %v878_v4 = vor.u32 %v1093_v60, %v877_v59 }
  0x22   : > { %482 = vmatpush.bf16.msra.mxu0 %v894_v44  ;;  %v879_v1 = vld [vmem:[%s1648_s1 + $0x28] sm:$0xf0]  ;;  %v1108_v2 = vld [vmem:[%s1648_s1 + $0xa4] sm:$0xf]  ;;  %v869_v5 = vld [vmem:[%s1648_s1 + $0x10] sm:$0xf]  ;;  %v942_v6 = vor.u32 %v1109_v63, %v941_v61 }
  0x23   : > { %495 = vmatpush.bf16.msra.mxu1 %v958_v45  ;;  %508 = vmatpush.bf16.msra.mxu2 %v898_v46  ;;  %v943_v3 = vld [vmem:[%s1648_s1 + $0xa8] sm:$0xf0]  ;;  %v882_v7 = vor.u32 %v1092_v0, %v879_v1  ;;  %v1091_v8 = vld [vmem:[%s1648_s1 + $0x14] sm:$0xf0]  ;;  %v933_v9 = vld [vmem:[%s1648_s1 + $0x90] sm:$0xf] }
  0x24   : > { %521 = vmatpush.bf16.msra.mxu3 %v962_v50  ;;  %v1107_v10 = vld [vmem:[%s1648_s1 + $0x94] sm:$0xf0]  ;;  %v946_v11 = vor.u32 %v1108_v2, %v943_v3  ;;  %v1090_v12 = vld [vmem:[%s1648_s1 + $0x14] sm:$0xf]  ;;  %v871_v13 = vld [vmem:[%s1648_s1 + $0x18] sm:$0xf0]  ;;  %v870_v17 = vor.u32 %v1091_v8, %v869_v5 }
  0x25   : > { %v1106_v14 = vld [vmem:[%s1648_s1 + $0x94] sm:$0xf]  ;;  %v935_v15 = vld [vmem:[%s1648_s1 + $0x98] sm:$0xf0]  ;;  %v861_v16 = vld [vmem:[%s1648_s1] sm:$0xf]  ;;  %v934_v20 = vor.u32 %v1107_v10, %v933_v9  ;;  %v874_v21 = vor.u32 %v1090_v12, %v871_v13 }
  0x26   : > { %483 = vmatpush.bf16.msra.mxu0 %v886_v56  ;;  %v1089_v18 = vld [vmem:[%s1648_s1 + $0x4] sm:$0xf0]  ;;  %v925_v19 = vld [vmem:[%s1648_s1 + $0x80] sm:$0xf]  ;;  %s273_s19 = scalar_select %p272_p10, %s1310_s28, 1  ;;  %v938_v25 = vor.u32 %v1106_v14, %v935_v15  ;;  %v1127_v34 = vld [vmem:[%s1650_s3 + $0x38] sm:$0xff] }
  0x27   : > { %496 = vmatpush.bf16.msra.mxu1 %v950_v57  ;;  %509 = vmatpush.bf16.msra.mxu2 %v890_v58  ;;  %v1105_v22 = vld [vmem:[%s1648_s1 + $0x84] sm:$0xf0]  ;;  %v1088_v23 = vld [vmem:[%s1648_s1 + $0x4] sm:$0xf]  ;;  %v863_v24 = vld [vmem:[%s1648_s1 + $0x8] sm:$0xf0]  ;;  %v862_v28 = vor.u32 %v1089_v18, %v861_v16 }
  0x28   : > { %522 = vmatpush.bf16.msra.mxu3 %v954_v62  ;;  %s1087_s9 = sshll.u32 %s273_s19, 4  ;;  %v1104_v26 = vld [vmem:[%s1648_s1 + $0x84] sm:$0xf]  ;;  %v927_v27 = vld [vmem:[%s1648_s1 + $0x88] sm:$0xf0]  ;;  %v926_v30 = vor.u32 %v1105_v22, %v925_v19  ;;  %v866_v31 = vor.u32 %v1088_v23, %v863_v24  ;;  %v1135_v36 = vld [vmem:[%s1650_s3 + $0x78] sm:$0xff] }
  0x29   : > { %s276_s20 = scalar_lea.vmem %s1647_s0, %s1087_s9  ;;  %v930_v33 = vor.u32 %v1104_v26, %v927_v27  ;;  %v1126_v38 = vld [vmem:[%s1650_s3 + $0x30] sm:$0xff]  ;;  %v1125_v40 = vld [vmem:[%s1650_s3 + $0x28] sm:$0xff]  ;;  %v1124_v42 = vld [vmem:[%s1650_s3 + $0x20] sm:$0xff]  ;;  %s792_s9 = sshll.u32 %s788_s21, 4  ;;  %s793_s9 = int_to_ptr.hbm [resolvable:$true] %s792_s9 }
  0x2a   : > { %484 = vmatpush.bf16.msra.mxu0 %v878_v4  ;;  %v277_v29 = vld [vmem:[%s276_s20] sm:$0xff]  ;;  %v278_v32 = vld [vmem:[%s276_s20 + $0x8] sm:$0xff]  ;;  %v1134_v39 = vld [vmem:[%s1650_s3 + $0x70] sm:$0xff]  ;;  %s1199_s28 = sshra.s32 %s793_s9, 4  ;;  %s1205_s20 = scalar_lea.hbm %s1654_s7, 16  ;;  %s1200_s28 = int_to_ptr.hbm [resolvable:$true] %s1199_s28 }
  0x2b   : > { %497 = vmatpush.bf16.msra.mxu1 %v942_v6  ;;  %510 = vmatpush.bf16.msra.mxu2 %v882_v7  ;;  %v279_v35 = vpack.c.bf16 %v277_v29, %v277_v29  ;;  %v280_v37 = vpack.c.bf16 %v278_v32, %v278_v32  ;;  %v1133_v41 = vld [vmem:[%s1650_s3 + $0x68] sm:$0xff]  ;;  %v1132_v43 = vld [vmem:[%s1650_s3 + $0x60] sm:$0xff]  ;;  %v1123_v44 = vld [vmem:[%s1650_s3 + $0x18] sm:$0xff]  ;;  %s1201_s14 = scalar_lea.hbm %s1200_s28, 8  ;;  %p1206_p0 = scmp.lt.s32.totalorder %s1200_s28, %s1654_s7 }
  0x2c   : > { %523 = vmatpush.bf16.msra.mxu3 %v946_v11  ;;  %v1122_v45 = vld [vmem:[%s1650_s3 + $0x10] sm:$0xff]  ;;  %v1131_v46 = vld [vmem:[%s1650_s3 + $0x58] sm:$0xff]  ;;  %v1121_v47 = vld [vmem:[%s1650_s3 + $0x8] sm:$0xff]  ;;  %p1202_p11 = scmp.ne.s32.totalorder %s1200_s28, %s1201_s14  ;;  %p1207_p1 = scmp.lt.s32.totalorder %s1205_s20, %s1201_s14 }
  0x2d   : > { %v1130_v48 = vld [vmem:[%s1650_s3 + $0x50] sm:$0xff]  ;;  %v1120_v49 = vld [vmem:[%s1650_s3] sm:$0xff]  ;;  %v1129_v50 = vld [vmem:[%s1650_s3 + $0x48] sm:$0xff] }
  0x2e   : > { %485 = vmatpush.bf16.msra.mxu0 %v870_v17  ;;  %v1128_v51 = vld [vmem:[%s1650_s3 + $0x40] sm:$0xff]  ;;  %v1143_v52 = vld [vmem:[%s1652_s5 + $0x38] sm:$0xff]  ;;  %v1142_v53 = vld [vmem:[%s1652_s5 + $0x30] sm:$0xff]  ;;  %p1203_p12 = pnand %p1202_p11, %p1327_p5  ;;  %p1208_p2 = por %p1207_p1, %p1206_p0 }
  0x2f   : > { %498 = vmatpush.bf16.msra.mxu1 %v934_v20  ;;  %511 = vmatpush.bf16.msra.mxu2 %v874_v21  ;;  %v1141_v54 = vld [vmem:[%s1652_s5 + $0x28] sm:$0xff]  ;;  %v313_v55 = vld [vmem:[%s1649_s2] sm:$0x3]  ;;  %v1139_v58 = vld [vmem:[%s1652_s5 + $0x18] sm:$0xff] }
  0x30   : > { %524 = vmatpush.bf16.msra.mxu3 %v938_v25  ;;  %v1140_v56 = vld [vmem:[%s1652_s5 + $0x20] sm:$0xff]  ;;  %v315_v57 = vperm.slane %v313_v55, 0  ;;  %v316_v63 = vperm.slane %v313_v55, 1  ;;  %v1138_v12 = vld [vmem:[%s1652_s5 + $0x10] sm:$0xff]  ;;  %v1137_v13 = vld [vmem:[%s1652_s5 + $0x8] sm:$0xff]  ;;  %p1204_p13 = pneg %p1203_p12 }
  0x31   : > { %v1136_v14 = vld [vmem:[%s1652_s5] sm:$0xff] }
  0x32   : > { %486 = vmatpush.bf16.msra.mxu0 %v862_v28  ;;  %v1183_v15 = vld [vmem:[%s1651_s4] ss:$0 sm:$0xff]  ;;  %p1209_p3 = pnand %p1208_p2, %p1204_p13 }
  0x33   : > { %499 = vmatpush.bf16.msra.mxu1 %v926_v30  ;;  %512 = vmatpush.bf16.msra.mxu2 %v866_v31  ;;  %v1184_v24 = vld [vmem:[%s1653_s6] ss:$0 sm:$0xff] }
  0x34   : > { %525 = vmatpush.bf16.msra.mxu3 %v930_v33 }
  0x35   : > { %487 = vmatmul.bf16.vlgmr.msra.gmra.mxu0 %v279_v35 }
  0x36   : > { %667 = vmatpush.bf16.msrb.mxu0 %v1127_v34  ;;  %500 = vmatmul.bf16.vlgmr.msra.gmra.mxu1 %v280_v37 }
  0x37   : > { %680 = vmatpush.bf16.msrb.mxu1 %v1135_v36  ;;  %513 = vmatmul.bf16.vlgmr.msra.gmra.mxu2 %v279_v35 }
  0x38   : > { %526 = vmatmul.bf16.vlgmr.msra.gmra.mxu3 %v280_v37  ;;  %763 = vmatpush.bf16.msrb.mxu2 %v1143_v52 }
  0x3a   : > { %668 = vmatpush.bf16.msrb.mxu0 %v1126_v38 }
  0x3b   : > { %681 = vmatpush.bf16.msrb.mxu1 %v1134_v39 }
  0x3c   : > { %764 = vmatpush.bf16.msrb.mxu2 %v1142_v53 }
  0x3e   : > { %669 = vmatpush.bf16.msrb.mxu0 %v1125_v40 }
  0x3f   : > { %682 = vmatpush.bf16.msrb.mxu1 %v1133_v41 }
  0x40   : > { %765 = vmatpush.bf16.msrb.mxu2 %v1141_v54 }
  0x42   : > { %670 = vmatpush.bf16.msrb.mxu0 %v1124_v42 }
  0x43   : > { %683 = vmatpush.bf16.msrb.mxu1 %v1132_v43 }
  0x44   : > { %766 = vmatpush.bf16.msrb.mxu2 %v1140_v56 }
  0x46   : > { %671 = vmatpush.bf16.msrb.mxu0 %v1123_v44 }
  0x47   : > { %684 = vmatpush.bf16.msrb.mxu1 %v1131_v46 }
  0x48   : > { %767 = vmatpush.bf16.msrb.mxu2 %v1139_v58 }
  0x4a   : > { %672 = vmatpush.bf16.msrb.mxu0 %v1122_v45 }
  0x4b   : > { %685 = vmatpush.bf16.msrb.mxu1 %v1130_v48 }
  0x4c   : > { %768 = vmatpush.bf16.msrb.mxu2 %v1138_v12 }
  0x4e   : > { %673 = vmatpush.bf16.msrb.mxu0 %v1121_v47 }
  0x4f   : > { %686 = vmatpush.bf16.msrb.mxu1 %v1129_v50 }
  0x50   : > { %769 = vmatpush.bf16.msrb.mxu2 %v1137_v13 }
  0x52   : > { %674 = vmatpush.bf16.msrb.mxu0 %v1120_v49 }
  0x53   : > { %687 = vmatpush.bf16.msrb.mxu1 %v1128_v51 }
  0x54   : > { %770 = vmatpush.bf16.msrb.mxu2 %v1136_v14 }
  0xb2   : > { %v488_v59 = vpop.f32.mrf.mxu0 }
  0xb3   : > { %v489_v60 = vadd.f32 %v488_v59, %v315_v57  ;;  %v501_v61 = vpop.f32.mrf.mxu1 }
  0xb5   : > { %v502_v62 = vadd.f32 %v501_v61, %v489_v60 }
  0xb7   : > { %v531_v0 = vmax.f32 %v502_v62, 0.0 }
  0xb9   : > { %v533_v1 = vpack.c.bf16 %v531_v0, %v531_v0 }
  0xba   : > { %v514_v2 = vpop.f32.mrf.mxu2  ;;  %v490_v5 = vpop.f32.mrf.mxu0 }
  0xbb   : > { %v515_v3 = vadd.f32 %v514_v2, %v316_v63  ;;  %v527_v4 = vpop.f32.mrf.mxu3  ;;  %v503_v6 = vpop.f32.mrf.mxu1  ;;  %675 = vmatmul.bf16.vlgmr.msrb.gmra.mxu0 %v533_v1 }
  0xbd   : > { %v528_v7 = vadd.f32 %v527_v4, %v515_v3 }
  0xbf   : > { %v532_v8 = vmax.f32 %v528_v7, 0.0 }
  0xc1   : > { %v534_v9 = vpack.c.bf16 %v532_v8, %v532_v8 }
  0xc2   : > { %v516_v10 = vpop.f32.mrf.mxu2 }
  0xc3   : > { %v529_v11 = vpop.f32.mrf.mxu3  ;;  %688 = vmatmul.bf16.vlgmr.msrb.gmra.mxu1 %v534_v9 }
 0x138   : > { %v676_v16 = vpop.f32.mrf.mxu0 }
 0x139   : > { %v677_v17 = vadd.f32 %v1183_v15, %v676_v16 }
 0x140   : > { %v689_v18 = vpop.f32.mrf.mxu1  ;;  %v678_v20 = vpop.f32.mrf.mxu0 }
 0x141   : > { %v690_v19 = vadd.f32 %v689_v18, %v677_v17 }
 0x143   : > { %v693_v21 = vmax.f32 %v690_v19, 0.0 }
 0x145   : > { %v694_v22 = vpack.c.bf16 %v693_v21, %v693_v21 }
 0x147   : > { %771 = vmatmul.bf16.vlgmr.msrb.gmra.mxu2 %v694_v22 }
 0x148   : > { %v691_v23 = vpop.f32.mrf.mxu1 }
 0x1ca   : > { %v772_v25 = vpop.f32.mrf.mxu2 }
 0x1cb   : > { %v773_v26 = vadd.f32 %v1184_v24, %v772_v25 }
 0x1cd   : > { %776 = vst [vmem:[%s271_s29] sm:$0xff] %v773_v26 }
 0x1ce   : > { %1212 = shalt.err (!%p1209_p3)
}
 0x1cf   : > { %1144 = dma.vmem_to_hbm [thread:$0]  (%p1327_p5), %s791_s8, 128, %s793_s9, %s778_s13  }
 0x1d2   : > { %v774_v27 = vpop.f32.mrf.mxu2 }
 0x1d3 PF: > { %p1150_p4 = scmp.ge.s32.totalorder %s1247_s27, 2  ;;  %s804_s16 = sand.u32 1, %s1235_s24  }
 0x1d4   : > { %s805_s21 = scalar_lea.sflag [#allocation3], %s804_s16 }
 0x1d5   : > { %p1147_p7 = pnand %p1150_p4, %p1331_p6 }
 0x1d7   : > { %p1148_p8 = pneg %p1147_p7 }
 0x1d9   : > { %1230 = dma.done.wait (%p1148_p8), %s805_s21, 128  }
 0x1da   : > { %1232 = vsyncadd (%p1148_p8), %s805_s21, 4294967168  ;;  %p17_p9 = scmp.ge.s32.totalorder %s1314_s30, 4   ;;  %s1657_s24 = smov %s1239_s25 }
 0x1db   : > { %s1658_s25 = smov %s1243_s26  ;;  %s1659_s26 = smov %s1325_s10 }
 0x1dc   : > { %s1660_s27 = smov %s1314_s30  ;;  %19 = sbr.rel (!%p17_p9) target bundleno = 3 (0x3), region = 83 }
 0x1e1   :  { %811 = vsyncpa [#allocation3], 1 }
 0x1e2   :  { %813 = vsyncpa [#allocation3 + $0x1], 1 }

</bundles_post_ra>
